<compile_context>
chip_gen: v6e
topology: v6e:2x2x1
jax: 0.10.0
libtpu: 0.0.40
codegen_flags: <defaults>
</compile_context>

<pallas_src>
import jax
import jax.numpy as jnp
from jax import lax
from jax.experimental import pallas as pl
from jax.experimental.pallas import tpu as pltpu

_LANES = 128
_SUBLANES = 8
_INV_SQRT2 = 0.7071067811865476
_SMALL_INPUT_BYTES = 1 << 20          # below this, plain jax.nn.gelu is cheaper
_VMEM_LIMIT_BYTES = 48 << 20          # safe on all gens (v7x physical = 64 MiB)
_DEFAULT_BLOCK_BYTES = 4 << 20        # ~85%+ of HBM roofline on v5e/v6e
_V7X_BLOCK_BYTES = 8 << 20            # v7x: 3.2 TB/s HBM -> amortize step overhead more


def _target_block_bytes() -> int:
    """Pick per-block byte budget; bigger on v7x-class parts (64 MiB VMEM, 3.2 TB/s HBM)."""
    try:
        vmem = pltpu.get_tpu_info().vmem_capacity_bytes
        if vmem <= (64 << 20):        # v7x-class TensorCore
            return _V7X_BLOCK_BYTES
    except Exception:
        pass
    return _DEFAULT_BLOCK_BYTES


def _gelu_kernel(x_ref, o_ref):
    x = x_ref[...]
    cdt = jnp.promote_types(x.dtype, jnp.float32)   # never silently downcast
    xf = x.astype(cdt)
    half_x = 0.5 * xf
    # Exact GELU: 0.5*x*(1 + erf(x/sqrt(2))).  Note: padded garbage in a partial
    # edge block flows through erf but those output elements are masked on store.
    o_ref[...] = (half_x + half_x * lax.erf(xf * _INV_SQRT2)).astype(o_ref.dtype)


def gelu_pallas(x: jax.Array, *, force_pallas: bool = False) -> jax.Array:
    orig_shape = x.shape
    dtype = x.dtype
    total = x.size

    if total == 0:
        return x

    itemsize = jnp.dtype(dtype).itemsize

    # Small-input fast path: launch/plumbing overhead dominates, let XLA fuse it.
    if not force_pallas and total * itemsize < _SMALL_INPUT_BYTES:
        return jax.nn.gelu(x, approximate=False)

    block_bytes = _target_block_bytes()
    rows_per_tile = max(
        _SUBLANES,
        (block_bytes // (_LANES * itemsize)) // _SUBLANES * _SUBLANES,
    )

    compiler_params = pltpu.CompilerParams(
        dimension_semantics=("parallel",),
        vmem_limit_bytes=_VMEM_LIMIT_BYTES,
    )

    if total % _LANES == 0:
        # Common path: lane-dense (rows, 128) slab — contiguous reshape, no HBM copy.
        x2d = x.reshape(-1, _LANES)
        n_rows = x2d.shape[0]
        tile = n_rows if n_rows <= rows_per_tile else rows_per_tile
        grid = (pl.cdiv(n_rows, tile),)
        out = pl.pallas_call(
            _gelu_kernel,
            out_shape=jax.ShapeDtypeStruct((n_rows, _LANES), dtype),
            grid_spec=pltpu.PrefetchScalarGridSpec(
                num_scalar_prefetch=0,
                grid=grid,
                in_specs=[pl.BlockSpec((tile, _LANES), lambda i: (i, 0))],
                out_specs=pl.BlockSpec((tile, _LANES), lambda i: (i, 0)),
            ),
            compiler_params=compiler_params,
        )(x2d)
        return out.reshape(orig_shape)

    # Ragged path (total % 128 != 0): no jnp.pad / output slice (each of those is
    # an extra full HBM pass).  Run a cdiv grid directly over the flat 1-D data;
    # the partial edge block's stores are masked by Pallas automatically.
    flat = x.reshape(-1)
    tile_elems = rows_per_tile * _LANES
    if total <= tile_elems:
        tile_elems = total            # full-extent block is always legal
    grid = (pl.cdiv(total, tile_elems),)
    out = pl.pallas_call(
        _gelu_kernel,
        out_shape=jax.ShapeDtypeStruct((total,), dtype),
        grid_spec=pltpu.PrefetchScalarGridSpec(
            num_scalar_prefetch=0,
            grid=grid,
            in_specs=[pl.BlockSpec((tile_elems,), lambda i: (i,))],
            out_specs=pl.BlockSpec((tile_elems,), lambda i: (i,)),
        ),
        compiler_params=compiler_params,
    )(flat)
    return out.reshape(orig_shape)


if __name__ == "__main__":
    key = jax.random.PRNGKey(0)
    k0, k1, k2 = jax.random.split(key, 3)

    # 1) Spec-like shape (NCHW, size divisible by 128): exercises the 2-D path.
    x = jax.random.normal(k0, (2, 4, 16, 16), dtype=jnp.float32)
    y = gelu_pallas(x, force_pallas=True)
    jax.block_until_ready(y)
    y_ref = jax.nn.gelu(x, approximate=False)
    assert y.shape == x.shape and y.dtype == x.dtype
    assert jnp.allclose(y, y_ref, atol=1e-5, rtol=1e-5)

    # 2) Ragged size (not a multiple of 128): exercises the zero-copy 1-D path.
    xr = jax.random.normal(k1, (3, 5, 7, 11), dtype=jnp.float32)
    yr = gelu_pallas(xr, force_pallas=True)
    jax.block_until_ready(yr)
    assert yr.shape == xr.shape
    assert jnp.allclose(yr, jax.nn.gelu(xr, approximate=False), atol=1e-5, rtol=1e-5)

    # 3) bf16 input: computed in f32 inside the kernel, cast back.
    xb = jax.random.normal(k2, (2, 4, 16, 16), dtype=jnp.bfloat16)
    yb = gelu_pallas(xb, force_pallas=True)
    jax.block_until_ready(yb)
    assert yb.dtype == jnp.bfloat16
    assert jnp.allclose(yb.astype(jnp.float32),
                        jax.nn.gelu(xb.astype(jnp.float32), approximate=False),
                        atol=2e-2, rtol=2e-2)

    print("KERNEL_OK")
</pallas_src>

<mosaic_0001>
module attributes {stable_mosaic.version = 11 : i64} {
  func.func @_gelu_kernel(%arg0: i32, %arg1: memref<16x128xf32, #tpu.memory_space<vmem>>, %arg2: memref<16x128xf32, #tpu.memory_space<vmem>>) attributes {dimension_semantics = [#tpu.dimension_semantics<parallel>], iteration_bounds = array<i64: 1>, scalar_prefetch = 0 : i64, scratch_operands = 0 : i64, tpu.core_type = #tpu.core_type<tc>, window_params = [{transform_indices = @transform_0, window_bounds = array<i64: 16, 128>}, {transform_indices = @transform_1, window_bounds = array<i64: 16, 128>}]} {
    %c0 = arith.constant 0 : index
    %c0_0 = arith.constant 0 : index
    %0 = vector.load %arg1[%c0, %c0_0] : memref<16x128xf32, #tpu.memory_space<vmem>>, vector<16x128xf32>
    %cst = arith.constant 5.000000e-01 : f32
    %1 = vector.broadcast %cst : f32 to vector<16x128xf32>
    %2 = arith.mulf %1, %0 : vector<16x128xf32>
    %cst_1 = arith.constant 0.707106769 : f32
    %3 = vector.broadcast %cst_1 : f32 to vector<16x128xf32>
    %4 = arith.mulf %0, %3 : vector<16x128xf32>
    %5 = math.erf %4 : vector<16x128xf32>
    %6 = arith.mulf %2, %5 : vector<16x128xf32>
    %7 = arith.addf %2, %6 : vector<16x128xf32>
    %c0_2 = arith.constant 0 : index
    %c0_3 = arith.constant 0 : index
    %8 = vector.load %arg2[%c0_2, %c0_3] : memref<16x128xf32, #tpu.memory_space<vmem>>, vector<16x128xf32>
    tpu.vector_store %arg2[%c0_2, %c0_3], %7 {strides = array<i32>} : memref<16x128xf32, #tpu.memory_space<vmem>>, vector<16x128xf32>,
    return
  }
  func.func @transform_0(%arg0: i32) -> (i32, i32) {
    %c0_i32 = arith.constant 0 : i32
    %c0_i32_0 = arith.constant 0 : i32
    return %arg0, %c0_i32 : i32, i32
  }
  func.func @transform_1(%arg0: i32) -> (i32, i32) {
    %c0_i32 = arith.constant 0 : i32
    %c0_i32_0 = arith.constant 0 : i32
    return %arg0, %c0_i32 : i32, i32
  }
}

</mosaic_0001>

<bundles_post_ra>
// kernel: tpu_custom_call.1
= control target key start
LH: loop header
LB: loop body
LE: loop exit
PB: predicated region body
PF: predicated region fallthrough
CT: control target
= control target key end

     0   :  { %6 = vsyncpa [#allocation3], 0  ;;  %s132_s0 = inlined_call_operand.hbm [shape: f32[16,128], index: 0, kind: input, shape index: {}]   ;;  %s133_s1 = inlined_call_operand.hbm [shape: f32[16,128], index: 1, kind: output, shape index: {}]  }
   0x1   :  { %7 = vsyncpa [#allocation4], 0  ;;  %s106_s6 = smov [#allocation2]  }
   0x2   :  { %s13_s7 = sshll.u32 %s106_s6, 4  ;;  %s14_s7 = int_to_ptr.vmem [resolvable:$true] %s13_s7 }
   0x3   :  { %s70_s8 = scalar_lea.vmem %s14_s7, 256  ;;  %p75_p1 = scmp.lt.s32.totalorder %s14_s7, %s14_s7 }
   0x4   :  { %p71_p0 = scmp.ne.s32.totalorder %s14_s7, %s70_s8  ;;  %p76_p2 = scmp.lt.s32.totalorder %s70_s8, %s70_s8 }
   0x6   :  { %p77_p3 = por %p76_p2, %p75_p1 }
   0x8   :  { %p78_p4 = pnand %p77_p3, %p71_p0 }
   0xa   :  { %81 = shalt.err (!%p78_p4)
}
   0xb   :  { %s107_s9 = smov 128   ;;  %s108_s10 = smov 8  }
   0xc   :  { %19 = dma.hbm_to_vmem [thread:$0]  %s132_s0, 256, %s14_s7, [#allocation3], %s107_s9, %s107_s9, %s108_s10  }
   0xd   :  { %102 = dma.done.wait [#allocation3], 256  }
   0xe   :  { %103 = vsyncadd [#allocation3], 4294967040  ;;  %v23_v0 = vld [vmem:[#allocation2] sm:$0xff]  ;;  %v24_v1 = vld [vmem:[#allocation2 + $0x8] sm:$0xff]  ;;  %s109_s13 = smov [#allocation5]  }
   0xf   :  { %v27_v2 = vmul.f32 0.70710677, %v23_v0  ;;  %v28_v3 = vmul.f32 0.70710677, %v24_v1  ;;  %v25_v4 = vmul.f32 0.5, %v23_v0  ;;  %v26_v5 = vmul.f32 0.5, %v24_v1 }
  0x10   :  { %s42_s14 = sshll.u32 %s109_s13, 4  ;;  %s43_s14 = int_to_ptr.vmem [resolvable:$true] %s42_s14 }
  0x11   :  { %58 = verf.f32 %v27_v2  ;;  %s82_s0 = scalar_lea.vmem %s43_s14, 256  ;;  %p87_p6 = scmp.lt.s32.totalorder %s43_s14, %s43_s14 }
  0x12   :  { %60 = verf.f32 %v28_v3  ;;  %p83_p5 = scmp.ne.s32.totalorder %s43_s14, %s82_s0  ;;  %p88_p7 = scmp.lt.s32.totalorder %s82_s0, %s82_s0 }
  0x14   :  { %p89_p8 = por %p88_p7, %p87_p6 }
  0x16   :  { %p90_p9 = pnand %p89_p8, %p83_p5 }
  0x1e   :  { %v59_v6 = vpop.eup %58 }
  0x1f   :  { %v61_v7 = vpop.eup %60  ;;  %v31_v8 = vmul.f32 %v59_v6, %v25_v4 }
  0x20   :  { %v32_v9 = vmul.f32 %v61_v7, %v26_v5 }
  0x21   :  { %v33_v10 = vadd.f32 %v31_v8, %v25_v4 }
  0x22   :  { %v34_v11 = vadd.f32 %v32_v9, %v26_v5 }
  0x23   :  { %35 = vst [vmem:[#allocation5] sm:$0xff] %v33_v10 }
  0x24   :  { %36 = vst [vmem:[#allocation5 + $0x8] sm:$0xff] %v34_v11 }
  0x25   :  { %93 = shalt.err (!%p90_p9)
}
  0x26   :  { %48 = dma.vmem_to_hbm [thread:$0]  %s43_s14, 256, %s133_s1, [#allocation4], %s107_s9, %s107_s9, %s108_s10  }
  0x27   :  { %104 = dma.done.wait [#allocation4], 256  }
  0x28   :  { %105 = vsyncadd [#allocation4], 4294967040 }
  0x29   :  { %52 = vsyncpa [#allocation3], 1 }
  0x2a   :  { %53 = vsyncpa [#allocation4], 1 }

</bundles_post_ra>
